<compile_context>
chip_gen: v6e
topology: v6e:2x2x1
jax: 0.10.0
libtpu: 0.0.40
codegen_flags: <defaults>
</compile_context>

<pallas_src>
import functools

import jax
import jax.numpy as jnp
from jax.experimental import pallas as pl
from jax.experimental.pallas import tpu as pltpu


# ----------------------------------------------------------------------------
# Fused kernel: scorer MLP -> perturbed top-k weighting -> regressor MLP.
# One block of Bb batch elements per grid step; everything stays in VMEM.
# ----------------------------------------------------------------------------
def fused_net_kernel(
    x_ref, noise_ref,
    w_cat_ref, sc_b1_ref, sc_w2_ref, sc_b2_ref,
    rg_b1_ref, rg_w2_ref, rg_b2_ref, rg_w3_ref, rg_b3_ref,
    feats_ref, scores_ref,
    px_ref, w_ref,
    *, k_int, sigma, t_chunk, t_pad,
):
    bb, t, d = x_ref.shape
    n = noise_ref.shape[-1]
    sc_hdim = sc_b1_ref.shape[-1]                      # scorer hidden width (256)

    x = x_ref[...]                                     # (Bb, T, D) f32
    xb = x.reshape(bb * t, d).astype(jnp.bfloat16)     # single bf16 cast of x

    # ---- fused first-layer matmul: [scorer W1 | regressor W1] in one stream
    h_cat = jnp.dot(xb, w_cat_ref[...],
                    preferred_element_type=jnp.float32)        # (Bb*T, 256+128)

    # ---- scorer head: ReLU -> Linear(256,1) -> Sigmoid
    h_sc = jnp.maximum(h_cat[:, :sc_hdim] + sc_b1_ref[...], 0.0)
    h_sc = h_sc.reshape(bb, t, sc_hdim)
    logit = jnp.sum(h_sc * sc_w2_ref[...], axis=-1, keepdims=True) + sc_b2_ref[0]
    s = jax.nn.sigmoid(logit)                                  # (Bb, T, 1)

    # ---- PerturbedTopK: perturbed scores with num_samples on the lane axis
    px = s + noise_ref[...] * sigma                            # (Bb, T, N)
    if t_pad > t:
        # pad query rows with -inf: they never beat a real key and their
        # (discarded) weights come out as zeros.
        pad = jnp.full((bb, t_pad - t, n), -jnp.inf, jnp.float32)
        px = jnp.concatenate([px, pad], axis=1)
    px_ref[...] = px                                           # (Bb, T_pad, N)

    n_chunks = t_pad // t_chunk

    # rank(t) = #{t' : px[t'] > px[t]}; selected iff rank < k;
    # weight(t) = mean_n[selected].  Chunk the query axis so the (Tc, T_pad, N)
    # pairwise tensor stays VMEM-bounded; ties are measure-zero with
    # continuous noise so no explicit tie-break is needed.
    def batch_body(b_idx, carry):
        px_k = px_ref[b_idx]                                   # (T_pad, N) keys

        def chunk_body(ci, carry2):
            lo = pl.multiple_of(ci * t_chunk, 8)
            px_q = px_ref[b_idx, pl.ds(lo, t_chunk), :]        # (Tc, N) queries
            gt = (px_k[None, :, :] > px_q[:, None, :]).astype(jnp.float32)
            rank = jnp.sum(gt, axis=1)                         # (Tc, N)
            sel = (rank < float(k_int)).astype(jnp.float32)
            w_ref[b_idx, pl.ds(lo, t_chunk), :] = jnp.mean(sel, axis=-1,
                                                           keepdims=True)
            return carry2

        return jax.lax.fori_loop(0, n_chunks, chunk_body, carry)

    jax.lax.fori_loop(0, bb, batch_body, 0)

    w = w_ref[...]                                             # (Bb, T_pad, 1)
    if t_pad > t:
        w = w[:, :t, :]
    x_ha = w * x                                               # (Bb, T, D)
    feats_ref[...] = x_ha

    # ---- regressor (assumed SMlp 512->128->32->1) + outer sigmoid
    # (w*x)@W1 == w*(x@W1): reuse the regressor columns of the fused matmul.
    h_rg = h_cat[:, sc_hdim:]                                  # (Bb*T, 128)
    h1 = jnp.maximum(w.reshape(bb * t, 1) * h_rg + rg_b1_ref[...], 0.0)
    h2 = jnp.dot(h1.astype(jnp.bfloat16), rg_w2_ref[...],
                 preferred_element_type=jnp.float32)           # (Bb*T, 32)
    h2 = jnp.maximum(h2 + rg_b2_ref[...], 0.0)
    h2 = h2.reshape(bb, t, h2.shape[-1])
    logit2 = jnp.sum(h2 * rg_w3_ref[...], axis=-1) + rg_b3_ref[0]   # (Bb, T)
    scores_ref[...] = jax.nn.sigmoid(logit2)[:, None, :]       # (Bb, 1, T) lane-dense


# ----------------------------------------------------------------------------
# Helpers
# ----------------------------------------------------------------------------
def _pick_t_chunk(t, n, budget_bytes=4 << 20):
    """Multiple-of-8 query-chunk size bounding the (Tc, T, N) pairwise tensor."""
    lane_n = ((n + 127) // 128) * 128
    per_row = max(t, 8) * lane_n * 4
    max_tc = max(8, (budget_bytes // per_row) // 8 * 8)
    t_ceil8 = ((t + 7) // 8) * 8
    return min(t_ceil8, max_tc)


def _pick_batch_block(b, t, target_rows=256):
    """Batch elements per grid step: aim for ~target_rows MXU M rows, keep grid>=2."""
    want = max(1, -(-target_rows // max(t, 1)))                # ceil(target / T)
    if b >= 2:
        want = min(want, max(1, b // 2))                       # both v7x TCs get work
    want = min(want, b)
    bb = 1
    for div in range(1, b + 1):                                # largest divisor <= want
        if b % div == 0 and div <= want:
            bb = div
    return bb


def init_params(key, d_in=512):
    ks = jax.random.split(key, 10)
    sc = 0.02
    return {
        # scorer: Linear(512,256) -> ReLU -> Linear(256,1) -> Sigmoid
        "sc_w1": jax.random.normal(ks[0], (d_in, 256), jnp.float32) * sc,
        "sc_b1": jnp.zeros((1, 256), jnp.float32),
        "sc_w2": jax.random.normal(ks[1], (1, 256), jnp.float32) * sc,  # row vector
        "sc_b2": jnp.zeros((1,), jnp.float32),                          # SMEM scalar
        # rgs (assumed SMlp): 512 -> 128 -> 32 -> 1
        "rg_w1": jax.random.normal(ks[2], (d_in, 128), jnp.float32) * sc,
        "rg_b1": jnp.zeros((1, 128), jnp.float32),
        "rg_w2": jax.random.normal(ks[3], (128, 32), jnp.float32) * sc,
        "rg_b2": jnp.zeros((1, 32), jnp.float32),
        "rg_w3": jax.random.normal(ks[4], (1, 32), jnp.float32) * sc,   # row vector
        "rg_b3": jnp.zeros((1,), jnp.float32),                          # SMEM scalar
    }


def network_forward(x, params, noise, *, k_frac=0.7, sigma=0.05):
    """x: (B, T, D) f32, noise: (B, T, num_samples) f32 iid N(0,1)."""
    B, T, D = x.shape
    N = noise.shape[-1]
    assert D == 512, "TODO(synk): Temporal embedding (dfeat != 512) not implemented"

    # --- PerturbedTopK k handling (static, mirrors the PyTorch forward) ------
    k_int = int(T * k_frac)
    if k_int > T:
        k_int = T
    elif k_int == 0:
        k_int = 1
    train_mode = B > 1            # matches HardAttention: hard_att(scores, b > 1)
    if not train_mode:
        k_int = min(1000, k_int)

    bb = _pick_batch_block(B, T)
    t_chunk = _pick_t_chunk(T, N)
    n_chunks = -(-T // t_chunk)
    t_pad = n_chunks * t_chunk

    # bf16 weights for the MXU matmuls (f32 accumulation in-kernel); the two
    # D=512 first-layer weights are fused column-wise into one matmul.
    w_cat = jnp.concatenate([params["sc_w1"], params["rg_w1"]],
                            axis=1).astype(jnp.bfloat16)                 # (512, 384)
    rg_w2 = params["rg_w2"].astype(jnp.bfloat16)

    kernel = functools.partial(fused_net_kernel, k_int=k_int, sigma=sigma,
                               t_chunk=t_chunk, t_pad=t_pad)

    feats, scores_b1t = pl.pallas_call(
        kernel,
        out_shape=(
            jax.ShapeDtypeStruct((B, T, D), jnp.float32),
            jax.ShapeDtypeStruct((B, 1, T), jnp.float32),      # lane-dense scores
        ),
        grid=(B // bb,),
        in_specs=[
            pl.BlockSpec((bb, T, D), lambda i: (i, 0, 0)),         # x
            pl.BlockSpec((bb, T, N), lambda i: (i, 0, 0)),         # noise (N on lanes)
            pl.BlockSpec(w_cat.shape, lambda i: (0, 0)),           # [sc_w1|rg_w1] bf16
            pl.BlockSpec(params["sc_b1"].shape, lambda i: (0, 0)),  # sc_b1
            pl.BlockSpec(params["sc_w2"].shape, lambda i: (0, 0)),  # sc_w2 row
            pl.BlockSpec(memory_space=pltpu.MemorySpace.SMEM),      # sc_b2 scalar
            pl.BlockSpec(params["rg_b1"].shape, lambda i: (0, 0)),  # rg_b1
            pl.BlockSpec(rg_w2.shape, lambda i: (0, 0)),            # rg_w2 bf16
            pl.BlockSpec(params["rg_b2"].shape, lambda i: (0, 0)),  # rg_b2
            pl.BlockSpec(params["rg_w3"].shape, lambda i: (0, 0)),  # rg_w3 row
            pl.BlockSpec(memory_space=pltpu.MemorySpace.SMEM),      # rg_b3 scalar
        ],
        out_specs=(
            pl.BlockSpec((bb, T, D), lambda i: (i, 0, 0)),         # feats (lane-dense)
            pl.BlockSpec((bb, 1, T), lambda i: (i, 0, 0)),         # scores (lane-dense)
        ),
        scratch_shapes=[
            pltpu.VMEM((bb, t_pad, N), jnp.float32),               # perturbed scores
            pltpu.VMEM((bb, t_pad, 1), jnp.float32),               # top-k weights
        ],
        compiler_params=pltpu.CompilerParams(
            dimension_semantics=("parallel",),
            vmem_limit_bytes=48 * 1024 * 1024),
    )(
        x, noise,
        w_cat, params["sc_b1"], params["sc_w2"], params["sc_b2"],
        params["rg_b1"], rg_w2, params["rg_b2"], params["rg_w3"], params["rg_b3"],
    )

    scores = jnp.transpose(scores_b1t, (0, 2, 1))   # (B, T, 1) — wrapper-side reshape
    return {"scores": scores, "feats": feats}


if __name__ == "__main__":
    B, T, D = 2, 8, 512          # D must be 512 (Identity embedding branch)
    num_samples = 128            # lane-dense Monte-Carlo sample count (module default 100)

    key = jax.random.PRNGKey(0)
    k_x, k_noise, k_params = jax.random.split(key, 3)

    x = jax.random.normal(k_x, (B, T, D), jnp.float32)
    # iid N(0,1) noise; laid out (B, T, num_samples) so samples ride the lane axis
    noise = jax.random.normal(k_noise, (B, T, num_samples), jnp.float32)
    params = init_params(k_params, d_in=D)

    out = network_forward(x, params, noise, k_frac=0.7, sigma=0.05)
    out = jax.block_until_ready(out)

    assert out["scores"].shape == (B, T, 1)
    assert out["feats"].shape == (B, T, D)
    assert bool(jnp.all(jnp.isfinite(out["scores"])))
    assert bool(jnp.all(jnp.isfinite(out["feats"])))
    assert bool(jnp.all((out["scores"] >= 0.0) & (out["scores"] <= 1.0)))
    print("KERNEL_OK")
</pallas_src>

<mosaic_0001>
module attributes {stable_mosaic.version = 11 : i64} {
  func.func @fused_net_kernel(%arg0: i32, %arg1: memref<1x8x512xf32, #tpu.memory_space<vmem>>, %arg2: memref<1x8x128xf32, #tpu.memory_space<vmem>>, %arg3: memref<512x384xbf16, #tpu.memory_space<vmem>>, %arg4: memref<1x256xf32, #tpu.memory_space<vmem>>, %arg5: memref<1x256xf32, #tpu.memory_space<vmem>>, %arg6: memref<1xf32, #tpu.memory_space<smem>>, %arg7: memref<1x128xf32, #tpu.memory_space<vmem>>, %arg8: memref<128x32xbf16, #tpu.memory_space<vmem>>, %arg9: memref<1x32xf32, #tpu.memory_space<vmem>>, %arg10: memref<1x32xf32, #tpu.memory_space<vmem>>, %arg11: memref<1xf32, #tpu.memory_space<smem>>, %arg12: memref<1x8x512xf32, #tpu.memory_space<vmem>>, %arg13: memref<1x1x8xf32, #tpu.memory_space<vmem>>, %arg14: memref<1x8x128xf32, #tpu.memory_space<vmem>>, %arg15: memref<1x8x1xf32, #tpu.memory_space<vmem>>) attributes {dimension_semantics = [#tpu.dimension_semantics<parallel>], iteration_bounds = array<i64: 2>, scalar_prefetch = 0 : i64, scratch_operands = 2 : i64, tpu.core_type = #tpu.core_type<tc>, window_params = [{transform_indices = @transform_0, window_bounds = array<i64: 1, 8, 512>}, {transform_indices = @transform_1, window_bounds = array<i64: 1, 8, 128>}, {pipeline_mode = #tpu.pipeline_mode<synchronous>, transform_indices = @transform_2, window_bounds = array<i64: 512, 384>}, {pipeline_mode = #tpu.pipeline_mode<synchronous>, transform_indices = @transform_3, window_bounds = array<i64: 1, 256>}, {pipeline_mode = #tpu.pipeline_mode<synchronous>, transform_indices = @transform_4, window_bounds = array<i64: 1, 256>}, {transform_indices = @transform_5, window_bounds = array<i64: 1>}, {pipeline_mode = #tpu.pipeline_mode<synchronous>, transform_indices = @transform_6, window_bounds = array<i64: 1, 128>}, {pipeline_mode = #tpu.pipeline_mode<synchronous>, transform_indices = @transform_7, window_bounds = array<i64: 128, 32>}, {pipeline_mode = #tpu.pipeline_mode<synchronous>, transform_indices = @transform_8, window_bounds = array<i64: 1, 32>}, {pipeline_mode = #tpu.pipeline_mode<synchronous>, transform_indices = @transform_9, window_bounds = array<i64: 1, 32>}, {transform_indices = @transform_10, window_bounds = array<i64: 1>}, {transform_indices = @transform_11, window_bounds = array<i64: 1, 8, 512>}, {transform_indices = @transform_12, window_bounds = array<i64: 1, 1, 8>}]} {
    %c0 = arith.constant 0 : index
    %c0_0 = arith.constant 0 : index
    %c0_1 = arith.constant 0 : index
    %0 = vector.load %arg1[%c0, %c0_0, %c0_1] : memref<1x8x512xf32, #tpu.memory_space<vmem>>, vector<1x8x512xf32>
    %1 = vector.shape_cast %0 : vector<1x8x512xf32> to vector<8x512xf32>
    %2 = arith.truncf %1 : vector<8x512xf32> to vector<8x512xbf16>
    %c0_2 = arith.constant 0 : index
    %c0_3 = arith.constant 0 : index
    %3 = vector.load %arg3[%c0_2, %c0_3] : memref<512x384xbf16, #tpu.memory_space<vmem>>, vector<512x384xbf16>
    %cst = arith.constant dense<0.000000e+00> : vector<8x384xf32>
    %4 = tpu.matmul %2, %3, %cst {dimension_numbers = #tpu.dot_dimension_numbers<[1], [0], [0], [1], [0, 0, 1, 1], [], []>} : vector<8x512xbf16>, vector<512x384xbf16>, vector<8x384xf32> -> vector<8x384xf32>
    %5 = vector.extract_strided_slice %4 {offsets = [0, 0], sizes = [8, 256], strides = [1, 1]} : vector<8x384xf32> to vector<8x256xf32>
    %c0_4 = arith.constant 0 : index
    %c0_5 = arith.constant 0 : index
    %6 = vector.load %arg4[%c0_4, %c0_5] : memref<1x256xf32, #tpu.memory_space<vmem>>, vector<1x256xf32>
    %7 = vector.broadcast %6 : vector<1x256xf32> to vector<8x256xf32>
    %8 = arith.addf %5, %7 : vector<8x256xf32>
    %cst_6 = arith.constant 0.000000e+00 : f32
    %9 = vector.broadcast %cst_6 : f32 to vector<8x256xf32>
    %10 = arith.maximumf %8, %9 : vector<8x256xf32>
    %11 = vector.shape_cast %10 : vector<8x256xf32> to vector<1x8x256xf32>
    %c0_7 = arith.constant 0 : index
    %c0_8 = arith.constant 0 : index
    %12 = vector.load %arg5[%c0_7, %c0_8] : memref<1x256xf32, #tpu.memory_space<vmem>>, vector<1x256xf32>
    %13 = vector.shape_cast %12 : vector<1x256xf32> to vector<1x1x256xf32>
    %14 = vector.broadcast %13 : vector<1x1x256xf32> to vector<1x8x256xf32>
    %15 = arith.mulf %11, %14 : vector<1x8x256xf32>
    %cst_9 = arith.constant dense<0.000000e+00> : vector<1x8xf32>
    %16 = vector.multi_reduction <add>, %15, %cst_9 [2] : vector<1x8x256xf32> to vector<1x8xf32>
    %17 = vector.shape_cast %16 : vector<1x8xf32> to vector<1x8x1xf32>
    %c0_10 = arith.constant 0 : index
    %18 = memref.load %arg6[%c0_10] : memref<1xf32, #tpu.memory_space<smem>>
    %19 = vector.broadcast %18 : f32 to vector<1x8x1xf32>
    %20 = arith.addf %17, %19 : vector<1x8x1xf32>
    %21 = arith.negf %20 : vector<1x8x1xf32>
    %22 = math.exp %21 : vector<1x8x1xf32>
    %cst_11 = arith.constant 1.000000e+00 : f32
    %23 = vector.broadcast %cst_11 : f32 to vector<1x8x1xf32>
    %24 = arith.addf %23, %22 : vector<1x8x1xf32>
    %25 = arith.divf %23, %24 : vector<1x8x1xf32>
    %c0_12 = arith.constant 0 : index
    %c0_13 = arith.constant 0 : index
    %c0_14 = arith.constant 0 : index
    %26 = vector.load %arg2[%c0_12, %c0_13, %c0_14] : memref<1x8x128xf32, #tpu.memory_space<vmem>>, vector<1x8x128xf32>
    %cst_15 = arith.constant 5.000000e-02 : f32
    %27 = vector.broadcast %cst_15 : f32 to vector<1x8x128xf32>
    %28 = arith.mulf %26, %27 : vector<1x8x128xf32>
    %29 = vector.broadcast %25 : vector<1x8x1xf32> to vector<1x8x128xf32>
    %30 = arith.addf %29, %28 : vector<1x8x128xf32>
    %c0_16 = arith.constant 0 : index
    %c0_17 = arith.constant 0 : index
    %c0_18 = arith.constant 0 : index
    %31 = vector.load %arg14[%c0_16, %c0_17, %c0_18] : memref<1x8x128xf32, #tpu.memory_space<vmem>>, vector<1x8x128xf32>
    tpu.vector_store %arg14[%c0_16, %c0_17, %c0_18], %30 {strides = array<i32>} : memref<1x8x128xf32, #tpu.memory_space<vmem>>, vector<1x8x128xf32>,
    %c0_i32 = arith.constant 0 : i32
    %32 = arith.index_cast %c0_i32 : i32 to index
    %c0_19 = arith.constant 0 : index
    %c0_20 = arith.constant 0 : index
    %33 = vector.load %arg14[%32, %c0_19, %c0_20] : memref<1x8x128xf32, #tpu.memory_space<vmem>>, vector<1x8x128xf32>
    %34 = vector.shape_cast %33 : vector<1x8x128xf32> to vector<8x128xf32>
    %c0_i32_21 = arith.constant 0 : i32
    %c8_i32 = arith.constant 8 : i32
    %35 = arith.muli %c0_i32_21, %c8_i32 : i32
    %36 = tpu.assume_multiple %35, 8 : i32
    %37 = arith.index_cast %c0_i32 : i32 to index
    %38 = arith.index_cast %36 : i32 to index
    %c0_22 = arith.constant 0 : index
    %39 = vector.load %arg14[%37, %38, %c0_22] : memref<1x8x128xf32, #tpu.memory_space<vmem>>, vector<1x8x128xf32>
    %40 = vector.shape_cast %39 : vector<1x8x128xf32> to vector<8x128xf32>
    %41 = vector.shape_cast %34 : vector<8x128xf32> to vector<1x8x128xf32>
    %42 = vector.shape_cast %40 : vector<8x128xf32> to vector<8x1x128xf32>
    %43 = vector.broadcast %41 : vector<1x8x128xf32> to vector<8x8x128xf32>
    %44 = vector.broadcast %42 : vector<8x1x128xf32> to vector<8x8x128xf32>
    %45 = arith.cmpf ogt, %43, %44 : vector<8x8x128xf32>
    %46 = arith.extui %45 : vector<8x8x128xi1> to vector<8x8x128xi32>
    %47 = arith.sitofp %46 : vector<8x8x128xi32> to vector<8x8x128xf32>
    %cst_23 = arith.constant dense<0.000000e+00> : vector<8x128xf32>
    %48 = vector.multi_reduction <add>, %47, %cst_23 [1] : vector<8x8x128xf32> to vector<8x128xf32>
    %cst_24 = arith.constant 5.000000e+00 : f32
    %49 = vector.broadcast %cst_24 : f32 to vector<8x128xf32>
    %50 = arith.cmpf olt, %48, %49 : vector<8x128xf32>
    %51 = arith.extui %50 : vector<8x128xi1> to vector<8x128xi32>
    %52 = arith.sitofp %51 : vector<8x128xi32> to vector<8x128xf32>
    %cst_25 = arith.constant dense<0.000000e+00> : vector<8xf32>
    %53 = vector.multi_reduction <add>, %52, %cst_25 [1] : vector<8x128xf32> to vector<8xf32>
    %54 = vector.shape_cast %53 : vector<8xf32> to vector<8x1xf32>
    %cst_26 = arith.constant 1.280000e+02 : f32
    %55 = vector.broadcast %cst_26 : f32 to vector<8x1xf32>
    %56 = arith.divf %54, %55 : vector<8x1xf32>
    %57 = arith.index_cast %c0_i32 : i32 to index
    %58 = arith.index_cast %36 : i32 to index
    %c0_27 = arith.constant 0 : index
    %59 = vector.load %arg15[%57, %58, %c0_27] : memref<1x8x1xf32, #tpu.memory_space<vmem>>, vector<1x8x1xf32>
    %60 = vector.shape_cast %59 : vector<1x8x1xf32> to vector<8x1xf32>
    %61 = vector.shape_cast %56 : vector<8x1xf32> to vector<1x8x1xf32>
    tpu.vector_store %arg15[%57, %58, %c0_27], %61 {strides = array<i32>} : memref<1x8x1xf32, #tpu.memory_space<vmem>>, vector<1x8x1xf32>,
    %c1_i32 = arith.constant 1 : i32
    %c1_i32_28 = arith.constant 1 : i32
    %c0_29 = arith.constant 0 : index
    %c0_30 = arith.constant 0 : index
    %c0_31 = arith.constant 0 : index
    %62 = vector.load %arg15[%c0_29, %c0_30, %c0_31] : memref<1x8x1xf32, #tpu.memory_space<vmem>>, vector<1x8x1xf32>
    %63 = vector.broadcast %62 : vector<1x8x1xf32> to vector<1x8x512xf32>
    %64 = arith.mulf %63, %0 : vector<1x8x512xf32>
    %c0_32 = arith.constant 0 : index
    %c0_33 = arith.constant 0 : index
    %c0_34 = arith.constant 0 : index
    %65 = vector.load %arg12[%c0_32, %c0_33, %c0_34] : memref<1x8x512xf32, #tpu.memory_space<vmem>>, vector<1x8x512xf32>
    tpu.vector_store %arg12[%c0_32, %c0_33, %c0_34], %64 {strides = array<i32>} : memref<1x8x512xf32, #tpu.memory_space<vmem>>, vector<1x8x512xf32>,
    %66 = vector.extract_strided_slice %4 {offsets = [0, 256], sizes = [8, 128], strides = [1, 1]} : vector<8x384xf32> to vector<8x128xf32>
    %67 = vector.shape_cast %62 : vector<1x8x1xf32> to vector<8x1xf32>
    %68 = vector.broadcast %67 : vector<8x1xf32> to vector<8x128xf32>
    %69 = arith.mulf %68, %66 : vector<8x128xf32>
    %c0_35 = arith.constant 0 : index
    %c0_36 = arith.constant 0 : index
    %70 = vector.load %arg7[%c0_35, %c0_36] : memref<1x128xf32, #tpu.memory_space<vmem>>, vector<1x128xf32>
    %71 = vector.broadcast %70 : vector<1x128xf32> to vector<8x128xf32>
    %72 = arith.addf %69, %71 : vector<8x128xf32>
    %cst_37 = arith.constant 0.000000e+00 : f32
    %73 = vector.broadcast %cst_37 : f32 to vector<8x128xf32>
    %74 = arith.maximumf %72, %73 : vector<8x128xf32>
    %75 = arith.truncf %74 : vector<8x128xf32> to vector<8x128xbf16>
    %c0_38 = arith.constant 0 : index
    %c0_39 = arith.constant 0 : index
    %76 = vector.load %arg8[%c0_38, %c0_39] : memref<128x32xbf16, #tpu.memory_space<vmem>>, vector<128x32xbf16>
    %cst_40 = arith.constant dense<0.000000e+00> : vector<8x32xf32>
    %77 = tpu.matmul %75, %76, %cst_40 {dimension_numbers = #tpu.dot_dimension_numbers<[1], [0], [0], [1], [0, 0, 1, 1], [], []>} : vector<8x128xbf16>, vector<128x32xbf16>, vector<8x32xf32> -> vector<8x32xf32>
    %c0_41 = arith.constant 0 : index
    %c0_42 = arith.constant 0 : index
    %78 = vector.load %arg9[%c0_41, %c0_42] : memref<1x32xf32, #tpu.memory_space<vmem>>, vector<1x32xf32>
    %79 = vector.broadcast %78 : vector<1x32xf32> to vector<8x32xf32>
    %80 = arith.addf %77, %79 : vector<8x32xf32>
    %cst_43 = arith.constant 0.000000e+00 : f32
    %81 = vector.broadcast %cst_43 : f32 to vector<8x32xf32>
    %82 = arith.maximumf %80, %81 : vector<8x32xf32>
    %83 = vector.shape_cast %82 : vector<8x32xf32> to vector<1x8x32xf32>
    %c0_44 = arith.constant 0 : index
    %c0_45 = arith.constant 0 : index
    %84 = vector.load %arg10[%c0_44, %c0_45] : memref<1x32xf32, #tpu.memory_space<vmem>>, vector<1x32xf32>
    %85 = vector.shape_cast %84 : vector<1x32xf32> to vector<1x1x32xf32>
    %86 = vector.broadcast %85 : vector<1x1x32xf32> to vector<1x8x32xf32>
    %87 = arith.mulf %83, %86 : vector<1x8x32xf32>
    %cst_46 = arith.constant dense<0.000000e+00> : vector<1x8xf32>
    %88 = vector.multi_reduction <add>, %87, %cst_46 [2] : vector<1x8x32xf32> to vector<1x8xf32>
    %c0_47 = arith.constant 0 : index
    %89 = memref.load %arg11[%c0_47] : memref<1xf32, #tpu.memory_space<smem>>
    %90 = vector.broadcast %89 : f32 to vector<1x8xf32>
    %91 = arith.addf %88, %90 : vector<1x8xf32>
    %92 = arith.negf %91 : vector<1x8xf32>
    %93 = math.exp %92 : vector<1x8xf32>
    %cst_48 = arith.constant 1.000000e+00 : f32
    %94 = vector.broadcast %cst_48 : f32 to vector<1x8xf32>
    %95 = arith.addf %94, %93 : vector<1x8xf32>
    %96 = arith.divf %94, %95 : vector<1x8xf32>
    %97 = vector.shape_cast %96 : vector<1x8xf32> to vector<1x1x8xf32>
    %c0_49 = arith.constant 0 : index
    %c0_50 = arith.constant 0 : index
    %c0_51 = arith.constant 0 : index
    %98 = vector.load %arg13[%c0_49, %c0_50, %c0_51] : memref<1x1x8xf32, #tpu.memory_space<vmem>>, vector<1x1x8xf32>
    tpu.vector_store %arg13[%c0_49, %c0_50, %c0_51], %97 {strides = array<i32>} : memref<1x1x8xf32, #tpu.memory_space<vmem>>, vector<1x1x8xf32>,
    return
  }
  func.func @transform_0(%arg0: i32) -> (i32, i32, i32) {
    %c0_i32 = arith.constant 0 : i32
    %c0_i32_0 = arith.constant 0 : i32
    %c0_i32_1 = arith.constant 0 : i32
    return %arg0, %c0_i32, %c0_i32_0 : i32, i32, i32
  }
  func.func @transform_1(%arg0: i32) -> (i32, i32, i32) {
    %c0_i32 = arith.constant 0 : i32
    %c0_i32_0 = arith.constant 0 : i32
    %c0_i32_1 = arith.constant 0 : i32
    return %arg0, %c0_i32, %c0_i32_0 : i32, i32, i32
  }
  func.func @transform_2(%arg0: i32) -> (i32, i32) {
    %c0_i32 = arith.constant 0 : i32
    %c0_i32_0 = arith.constant 0 : i32
    %c0_i32_1 = arith.constant 0 : i32
    return %c0_i32, %c0_i32_0 : i32, i32
  }
  func.func @transform_3(%arg0: i32) -> (i32, i32) {
    %c0_i32 = arith.constant 0 : i32
    %c0_i32_0 = arith.constant 0 : i32
    %c0_i32_1 = arith.constant 0 : i32
    return %c0_i32, %c0_i32_0 : i32, i32
  }
  func.func @transform_4(%arg0: i32) -> (i32, i32) {
    %c0_i32 = arith.constant 0 : i32
    %c0_i32_0 = arith.constant 0 : i32
    %c0_i32_1 = arith.constant 0 : i32
    return %c0_i32, %c0_i32_0 : i32, i32
  }
  func.func @transform_5(%arg0: i32) -> i32 {
    %c0_i32 = arith.constant 0 : i32
    %c0_i32_0 = arith.constant 0 : i32
    return %c0_i32 : i32
  }
  func.func @transform_6(%arg0: i32) -> (i32, i32) {
    %c0_i32 = arith.constant 0 : i32
    %c0_i32_0 = arith.constant 0 : i32
    %c0_i32_1 = arith.constant 0 : i32
    return %c0_i32, %c0_i32_0 : i32, i32
  }
  func.func @transform_7(%arg0: i32) -> (i32, i32) {
    %c0_i32 = arith.constant 0 : i32
    %c0_i32_0 = arith.constant 0 : i32
    %c0_i32_1 = arith.constant 0 : i32
    return %c0_i32, %c0_i32_0 : i32, i32
  }
  func.func @transform_8(%arg0: i32) -> (i32, i32) {
    %c0_i32 = arith.constant 0 : i32
    %c0_i32_0 = arith.constant 0 : i32
    %c0_i32_1 = arith.constant 0 : i32
    return %c0_i32, %c0_i32_0 : i32, i32
  }
  func.func @transform_9(%arg0: i32) -> (i32, i32) {
    %c0_i32 = arith.constant 0 : i32
    %c0_i32_0 = arith.constant 0 : i32
    %c0_i32_1 = arith.constant 0 : i32
    return %c0_i32, %c0_i32_0 : i32, i32
  }
  func.func @transform_10(%arg0: i32) -> i32 {
    %c0_i32 = arith.constant 0 : i32
    %c0_i32_0 = arith.constant 0 : i32
    return %c0_i32 : i32
  }
  func.func @transform_11(%arg0: i32) -> (i32, i32, i32) {
    %c0_i32 = arith.constant 0 : i32
    %c0_i32_0 = arith.constant 0 : i32
    %c0_i32_1 = arith.constant 0 : i32
    return %arg0, %c0_i32, %c0_i32_0 : i32, i32, i32
  }
  func.func @transform_12(%arg0: i32) -> (i32, i32, i32) {
    %c0_i32 = arith.constant 0 : i32
    %c0_i32_0 = arith.constant 0 : i32
    %c0_i32_1 = arith.constant 0 : i32
    return %arg0, %c0_i32, %c0_i32_0 : i32, i32, i32
  }
}

</mosaic_0001>

<bundles_post_ra>
// kernel: tpu_custom_call.1
= control target key start
LH: loop header
LB: loop body
LE: loop exit
PB: predicated region body
PF: predicated region fallthrough
CT: control target
= control target key end

     0   :  { %s2718_s0 = inlined_call_operand.vmem [shape: f32[2,8,512], index: 0, kind: input, shape index: {}]   ;;  %s2719_s1 = inlined_call_operand.vmem [shape: f32[2,8,128], index: 1, kind: input, shape index: {}]   ;;  %s2720_s2 = inlined_call_operand.hbm [shape: bf16[512,384], index: 2, kind: input, shape index: {}]   ;;  %s2721_s3 = inlined_call_operand.vmem [shape: f32[1,256], index: 3, kind: input, shape index: {}]   ;;  %s2722_s4 = inlined_call_operand.vmem [shape: f32[1,256], index: 4, kind: input, shape index: {}]   ;;  %s2723_s5 = inlined_call_operand.<no memory space> [shape: f32[1], index: 5, kind: input, shape index: {}]   ;;  %s2724_s6 = inlined_call_operand.vmem [shape: f32[1,128], index: 6, kind: input, shape index: {}]   ;;  %s2725_s7 = inlined_call_operand.vmem [shape: bf16[128,32], index: 7, kind: input, shape index: {}]   ;;  %s2726_s8 = inlined_call_operand.vmem [shape: f32[1,32], index: 8, kind: input, shape index: {}]   ;;  %s2727_s9 = inlined_call_operand.vmem [shape: f32[1,32], index: 9, kind: input, shape index: {}]   ;;  %s2728_s10 = inlined_call_operand.<no memory space> [shape: f32[1], index: 10, kind: input, shape index: {}]   ;;  %s2729_s11 = inlined_call_operand.hbm [shape: f32[2,8,512], index: 11, kind: output, shape index: {0}]   ;;  %s2730_s12 = inlined_call_operand.hbm [shape: f32[2,1,8], index: 12, kind: output, shape index: {1}]  }
   0x1   :  { %2731 = sst [smem:[#allocation15_spill]] %s2718_s0 }
   0x2   :  { %2732 = sst [smem:[#allocation16_spill]] %s2719_s1 }
   0x3   :  { %2733 = sst [smem:[#allocation17_spill]] %s2720_s2 }
   0x4   :  { %18 = sst [smem:[#allocation4]] %s2723_s5 }
   0x5   :  { %19 = sst [smem:[#allocation5]] %s2728_s10 }
   0x6   :  { %20 = vsyncpa [#allocation7], 0 }
   0x7   :  { %21 = vsyncpa [#allocation8], 0 }
   0x8   :  { %23 = vsyncpa [#allocation8 + $0x1], 0 }
   0x9   :  { %24 = vsyncpa [#allocation11], 0 }
   0xa   :  { %26 = vsyncpa [#allocation11 + $0x1], 0  ;;  %s2466_s25 = smov 0   ;;  %s2468_s26 = smov 0  }
   0xb   :  { %s2470_s27 = smov 0   ;;  %s2472_s28 = smov 0  }
   0xc LB: > { %s2487_s5 = sadd.s32 4294967295, %s2384_s28   ;;  %s1841_s10 = sadd.s32 4294967294, %s2384_s28   ;;  %s2384_s28 = sphi %s2472_s28, %s2744_s28   ;;  %s2380_s27 = sphi %s2470_s27, %s2743_s27   ;;  %s2376_s26 = sphi %s2468_s26, %s2742_s26   ;;  %s2372_s25 = sphi %s2466_s25, %s2741_s25  }
   0xd   : > { %s2491_s29 = sadd.s32 1, %s2384_s28   ;;  %s280_s30 = sadd.s32 1, %s2380_s27 }
   0xe   : > { %s277_s13 = ssub.s32 %s2384_s28, %s2491_s29  ;;  %p290_p0 = scmp.ne.s32.totalorder %s2380_s27, %s2376_s26 }
   0xf   : > { %p278_p1 = scmp.eq.s32.totalorder %s277_s13, 0  ;;  %p291_p2 = scmp.eq.s32.totalorder %s2487_s5, 1 }
  0x10   : > { %p296_p3 = scmp.ne.s32.totalorder %s2376_s26, %s2372_s25  ;;  %p297_p4 = scmp.eq.s32.totalorder %s1841_s10, 1 }
  0x11   : > { %s2502_s14 = scalar_select %p278_p1, %s2380_s27, %s280_s30  }
  0x12   : > { %p2504_p5 = por %p291_p2, %p290_p0  ;;  %p2508_p6 = por %p297_p4, %p296_p3 }
  0x13   : > { %p1842_p7 = scmp.ge.s32.totalorder %s2384_s28, 1  ;;  %p330_p8 = scmp.lt.s32.totalorder %s2384_s28, 3 }
  0x14   : > { %s2735_s16 = scalar_select %p2508_p6, 1, 0 }
  0x15   : > { %p2076_p9 = scmp.eq.s32.totalorder %s2487_s5, 0  ;;  %p2515_p10 = pnand %p1842_p7, %p330_p8 }
  0x16   : > { %s2386_s18 = smov [#allocation6]  }
  0x17   : > { %s342_s19 = sshll.u32 %s2386_s18, 4  ;;  %p2065_p11 = pneg %p2515_p10  ;;  %s343_s19 = int_to_ptr.vmem [resolvable:$true] %s342_s19 }
  0x18   : > { %s2275_s20 = scalar_lea.vmem %s343_s19, 12288  ;;  %p2283_p3 = scmp.lt.s32.totalorder %s343_s19, %s343_s19 }
  0x19   : > { %p2066_p12 = pnand %p2076_p9, %p2065_p11  ;;  %p2276_p0 = scmp.ne.s32.totalorder %s343_s19, %s2275_s20 }
  0x1a   : > { %p2284_p4 = scmp.lt.s32.totalorder %s2275_s20, %s2275_s20 }
  0x1b   : > { %p2266_p13 = pneg %p2066_p12 }
  0x1c   : > { %p2285_p6 = por %p2284_p4, %p2283_p3 }
  0x1d   : > { %p2278_p1 = pnand %p2276_p0, %p2266_p13 }
  0x1f   : > { %p2279_p2 = pneg %p2278_p1 }
  0x21   : > { %p2286_p7 = pnand %p2285_p6, %p2279_p2 }
  0x23   : > { %2289 = shalt.err (!%p2286_p7)
}
  0x24   : > { %s2387_s21 = smov 192   ;;  %s2388_s22 = smov 12  }
  0x25   : > { %s2737_s2 = sld [smem:[#allocation17_spill]] }
  0x27   : > { %397 = sbr.rel (%p2515_p10) target bundleno = 1192 (0x4a8), region = 64 }
  0x2b   : > { %2068 = dma.hbm_to_vmem [thread:$0]  (!%p2066_p12), %s2737_s2, 12288, %s343_s19, [#allocation7], %s2387_s21, %s2387_s21, %s2388_s22  }
  0x2c   : > { %2359 = dma.done.wait (%p2076_p9), [#allocation7], 12288  }
  0x2d   : > { %2361 = vsyncadd (%p2076_p9), [#allocation7], 4294955008  ;;  %v2120_v0 = vld [vmem:[#allocation6 + $0xac] ss:$12 sps:$4 sm:$0xff]   ;;  %v2124_v2 = vld [vmem:[#allocation6 + $0xa8] ss:$12 sps:$4 sm:$0xff]  }
  0x2e   : > { %v2122_v1 = vld [vmem:[#allocation6 + $0x22c] ss:$12 sps:$4 sm:$0xff]   ;;  %1105 = vmatprep.subr.bf16.mxu0 %v2120_v0  ;;  %v2125_v3 = vld [vmem:[#allocation6 + $0x228] ss:$12 sps:$4 sm:$0xff]   ;;  %v2130_v6 = vld [vmem:[#allocation6 + $0x90] ss:$12 sps:$4 sm:$0xff]  }
  0x2f   : > { %1146 = vmatprep.subr.bf16.mxu1 %v2122_v1  ;;  %v2126_v4 = vld [vmem:[#allocation6 + $0x94] ss:$12 sps:$4 sm:$0xff]   ;;  %1106 = vmatpush1.bf16.msra.mxu0 %v2124_v2  ;;  %v2131_v7 = vld [vmem:[#allocation6 + $0x210] ss:$12 sps:$4 sm:$0xff]   ;;  %v2136_v10 = vld [vmem:[#allocation6 + $0x78] ss:$12 sps:$4 sm:$0xff]  }
  0x30   : > { %1147 = vmatpush1.bf16.msra.mxu1 %v2125_v3  ;;  %v2128_v5 = vld [vmem:[#allocation6 + $0x214] ss:$12 sps:$4 sm:$0xff]   ;;  %1107 = vmatprep.subr.bf16.mxu0 %v2126_v4  ;;  %v2132_v8 = vld [vmem:[#allocation6 + $0x7c] ss:$12 sps:$4 sm:$0xff]   ;;  %v2137_v11 = vld [vmem:[#allocation6 + $0x1f8] ss:$12 sps:$4 sm:$0xff]  }
  0x31   : > { %1148 = vmatprep.subr.bf16.mxu1 %v2128_v5  ;;  %v2134_v9 = vld [vmem:[#allocation6 + $0x1fc] ss:$12 sps:$4 sm:$0xff]   ;;  %v2138_v12 = vld [vmem:[#allocation6 + $0x64] ss:$12 sps:$4 sm:$0xff]   ;;  %v2142_v14 = vld [vmem:[#allocation6 + $0x60] ss:$12 sps:$4 sm:$0xff]  }
  0x32   : > { %v2140_v13 = vld [vmem:[#allocation6 + $0x1e4] ss:$12 sps:$4 sm:$0xff]   ;;  %v2143_v15 = vld [vmem:[#allocation6 + $0x1e0] ss:$12 sps:$4 sm:$0xff]   ;;  %v2148_v18 = vld [vmem:[#allocation6 + $0x48] ss:$12 sps:$4 sm:$0xff]  }
  0x33   : > { %1108 = vmatpush1.bf16.msra.mxu0 %v2130_v6  ;;  %v2144_v16 = vld [vmem:[#allocation6 + $0x4c] ss:$12 sps:$4 sm:$0xff]   ;;  %v2149_v19 = vld [vmem:[#allocation6 + $0x1c8] ss:$12 sps:$4 sm:$0xff]   ;;  %v2154_v22 = vld [vmem:[#allocation6 + $0x30] ss:$12 sps:$4 sm:$0xff]  }
  0x34   : > { %1149 = vmatpush1.bf16.msra.mxu1 %v2131_v7  ;;  %1109 = vmatprep.subr.bf16.mxu0 %v2132_v8  ;;  %v2146_v17 = vld [vmem:[#allocation6 + $0x1cc] ss:$12 sps:$4 sm:$0xff]   ;;  %v2150_v20 = vld [vmem:[#allocation6 + $0x34] ss:$12 sps:$4 sm:$0xff]   ;;  %v2155_v23 = vld [vmem:[#allocation6 + $0x1b0] ss:$12 sps:$4 sm:$0xff]   ;;  %v1269_v8 = vlaneseq }
  0x35   : > { %1150 = vmatprep.subr.bf16.mxu1 %v2134_v9  ;;  %v2152_v21 = vld [vmem:[#allocation6 + $0x1b4] ss:$12 sps:$4 sm:$0xff]   ;;  %v2156_v24 = vld [vmem:[#allocation6 + $0x1c] ss:$12 sps:$4 sm:$0xff]   ;;  %v2160_v26 = vld [vmem:[#allocation6 + $0x18] ss:$12 sps:$4 sm:$0xff]  }
  0x36   : > { %v2158_v25 = vld [vmem:[#allocation6 + $0x19c] ss:$12 sps:$4 sm:$0xff]   ;;  %v2161_v27 = vld [vmem:[#allocation6 + $0x198] ss:$12 sps:$4 sm:$0xff]   ;;  %v2166_v30 = vld [vmem:[#allocation6] ss:$12 sps:$4 sm:$0xff]  }
  0x37   : > { %1110 = vmatpush1.bf16.msra.mxu0 %v2136_v10  ;;  %v2162_v28 = vld [vmem:[#allocation6 + $0x4] ss:$12 sps:$4 sm:$0xff]   ;;  %v2167_v31 = vld [vmem:[#allocation6 + $0x180] ss:$12 sps:$4 sm:$0xff]   ;;  %p447_p6 = scmp.lt.s32.totalorder %s2487_s5, 1  ;;  %s2738_s0 = sld [smem:[#allocation15_spill]] }
  0x38   : > { %1151 = vmatpush1.bf16.msra.mxu1 %v2137_v11  ;;  %1111 = vmatprep.subr.bf16.mxu0 %v2138_v12  ;;  %v2164_v29 = vld [vmem:[#allocation6 + $0x184] ss:$12 sps:$4 sm:$0xff]   ;;  %v2168_v32 = vld [vmem:[#allocation6 + $0x16c] ss:$12 sps:$4 sm:$0xff]   ;;  %v2172_v34 = vld [vmem:[#allocation6 + $0x168] ss:$12 sps:$4 sm:$0xff]  }
  0x39   : > { %1152 = vmatprep.subr.bf16.mxu1 %v2140_v13  ;;  %v2170_v33 = vld [vmem:[#allocation6 + $0x2ec] ss:$12 sps:$4 sm:$0xff]   ;;  %v2173_v35 = vld [vmem:[#allocation6 + $0x2e8] ss:$12 sps:$4 sm:$0xff]   ;;  %s2534_s10 = scalar_select %p447_p6, %s2487_s5, 1  ;;  %v2569_v9 = vshrl.u32 %v1269_v8, 7 }
  0x3a   : > { %v2174_v36 = vld [vmem:[#allocation6 + $0x154] ss:$12 sps:$4 sm:$0xff]   ;;  %v2178_v38 = vld [vmem:[#allocation6 + $0x150] ss:$12 sps:$4 sm:$0xff]   ;;  %v2184_v42 = vld [vmem:[#allocation6 + $0x138] ss:$12 sps:$4 sm:$0xff]  }
  0x3b   : > { %1112 = vmatpush1.bf16.msra.mxu0 %v2142_v14  ;;  %v2176_v37 = vld [vmem:[#allocation6 + $0x2d4] ss:$12 sps:$4 sm:$0xff]   ;;  %v2179_v39 = vld [vmem:[#allocation6 + $0x2d0] ss:$12 sps:$4 sm:$0xff]   ;;  %s1982_s30 = sshll.u32 %s2534_s10, 5  ;;  %v2572_v10 = vsub.s32 0, %v2569_v9 }
  0x3c   : > { %1153 = vmatpush1.bf16.msra.mxu1 %v2143_v15  ;;  %1113 = vmatprep.subr.bf16.mxu0 %v2144_v16  ;;  %v2180_v40 = vld [vmem:[#allocation6 + $0x13c] ss:$12 sps:$4 sm:$0xff]   ;;  %v2185_v43 = vld [vmem:[#allocation6 + $0x2b8] ss:$12 sps:$4 sm:$0xff]   ;;  %v2190_v47 = vld [vmem:[#allocation6 + $0x120] ss:$12 sps:$4 sm:$0xff]  }
  0x3d   : > { %1154 = vmatprep.subr.bf16.mxu1 %v2146_v17  ;;  %v2182_v41 = vld [vmem:[#allocation6 + $0x2bc] ss:$12 sps:$4 sm:$0xff]   ;;  %s2540_s18 = scalar_lea.vmem %s2738_s0, %s1982_s30  ;;  %v2186_v44 = vld [vmem:[#allocation6 + $0x124] ss:$12 sps:$4 sm:$0xff]   ;;  %v2191_v48 = vld [vmem:[#allocation6 + $0x2a0] ss:$12 sps:$4 sm:$0xff]  }
  0x3e   : > { %v2188_v45 = vld [vmem:[#allocation6 + $0x2a4] ss:$12 sps:$4 sm:$0xff]   ;;  %v2192_v51 = vld [vmem:[#allocation6 + $0x10c] ss:$12 sps:$4 sm:$0xff]   ;;  %v2196_v54 = vld [vmem:[#allocation6 + $0x108] ss:$12 sps:$4 sm:$0xff]  }
  0x3f   : > { %1114 = vmatpush1.bf16.msra.mxu0 %v2148_v18  ;;  %v2543_v46 = vld [vmem:[%s2540_s18 + $0x8] sm:$0xff]  ;;  %v2548_v50 = vld [vmem:[%s2540_s18 + $0x18] sm:$0xff]  ;;  %v2194_v52 = vld [vmem:[#allocation6 + $0x28c] ss:$12 sps:$4 sm:$0xff]   ;;  %v1275_v12 = vsub.s32 1, %v2569_v9  ;;  %s1300_s23 = sld [smem:[#allocation4]] }
  0x40   : > { %1155 = vmatpush1.bf16.msra.mxu1 %v2149_v19  ;;  %1115 = vmatprep.subr.bf16.mxu0 %v2150_v20  ;;  %v462_v49 = vpack.c.bf16 %v2543_v46, %v2543_v46  ;;  %v464_v53 = vpack.c.bf16 %v2548_v50, %v2548_v50  ;;  %v2197_v55 = vld [vmem:[#allocation6 + $0x288] ss:$12 sps:$4 sm:$0xff]   ;;  %v2202_v58 = vld [vmem:[#allocation6 + $0xf0] ss:$12 sps:$4 sm:$0xff]   ;;  %v2208_v62 = vld [vmem:[#allocation6 + $0xd8] ss:$12 sps:$4 sm:$0xff]  }
  0x41   : > { %1156 = vmatprep.subr.bf16.mxu1 %v2152_v21  ;;  %v2198_v56 = vld [vmem:[#allocation6 + $0xf4] ss:$12 sps:$4 sm:$0xff]   ;;  %v2203_v59 = vld [vmem:[#allocation6 + $0x270] ss:$12 sps:$4 sm:$0xff]   ;;  %v2209_v63 = vld [vmem:[#allocation6 + $0x258] ss:$12 sps:$4 sm:$0xff]  }
  0x42   : > { %1137 = vmatprep.mubr.bf16.mxu0 %v462_v49  ;;  %1178 = vmatprep.mubr.bf16.mxu1 %v464_v53  ;;  %v2200_v57 = vld [vmem:[#allocation6 + $0x274] ss:$12 sps:$4 sm:$0xff]   ;;  %v2204_v60 = vld [vmem:[#allocation6 + $0xdc] ss:$12 sps:$4 sm:$0xff]   ;;  %v2210_v0 = vld [vmem:[#allocation6 + $0xc4] ss:$12 sps:$4 sm:$0xff]  }
  0x43   : > { %1116 = vmatpush1.bf16.msra.mxu0 %v2154_v22  ;;  %v2206_v61 = vld [vmem:[#allocation6 + $0x25c] ss:$12 sps:$4 sm:$0xff]   ;;  %v2212_v1 = vld [vmem:[#allocation6 + $0x244] ss:$12 sps:$4 sm:$0xff]   ;;  %v2214_v2 = vld [vmem:[#allocation6 + $0xc0] ss:$12 sps:$4 sm:$0xff]  }
  0x44   : > { %1157 = vmatpush1.bf16.msra.mxu1 %v2155_v23  ;;  %1117 = vmatprep.subr.bf16.mxu0 %v2156_v24  ;;  %v2215_v3 = vld [vmem:[#allocation6 + $0x240] ss:$12 sps:$4 sm:$0xff]   ;;  %v2553_v4 = vld [vmem:[%s2540_s18] sm:$0xff]  ;;  %s1850_s24 = sshll.u32 %s2534_s10, 3  ;;  %s2739_s1 = sld [smem:[#allocation16_spill]]  ;;  %vm1509_vm12 = vcmask 1041409  }
  0x45   : > { %1158 = vmatprep.subr.bf16.mxu1 %v2158_v25  ;;  %v2556_v5 = vld [vmem:[%s2540_s18 + $0x10] sm:$0xff]  ;;  %v2560_v6 = vpack.c.bf16 %v2553_v4, %v2553_v4  ;;  %v1267_v11 = vld [vmem:[%s2721_s3] sm:$0x3]  ;;  %vm1511_vm13 = vcmask 1042434   ;;  %vm1513_vm15 = vcmask 1043459   ;;  %s2648_s22 = sand.u32 1, %s2376_s26  }
  0x46   : > { %v2564_v7 = vpack.c.bf16 %v2556_v5, %v2556_v5  ;;  %v1272_v13 = vrot.slane %v1267_v11, %v2572_v10  ;;  %v1276_v17 = vrot.slane %v1267_v11, %v1275_v12  ;;  %v1283_v20 = vld [vmem:[%s2722_s4] sm:$0x3]  ;;  %v2247_v11 = vld [vmem:[#allocation6 + $0x188] ss:$12 sps:$4 sm:$0xff]   ;;  %s1983_s20 = sshll.u32 %s2487_s5, 9  ;;  %s2393_s18 = smov [#allocation9]  }
  0x47   : > { %1118 = vmatpush1.bf16.msra.mxu0 %v2160_v26  ;;  %s2294_s19 = sshll.u32 %s2393_s18, 4  ;;  %s2295_s19 = int_to_ptr.vmem [resolvable:$false] %s2294_s19 }
  0x48   : > { %1159 = vmatpush1.bf16.msra.mxu1 %v2161_v27  ;;  %1119 = vmatprep.subr.bf16.mxu0 %v2162_v28  ;;  %v1288_v27 = vrot.slane %v1283_v20, %v2572_v10  ;;  %v1292_v28 = vrot.slane %v1283_v20, %v1275_v12  ;;  %v2389_v12 = vmov 0.0   ;;  %s2296_s0 = scalar_lea.vmem %s2295_s19, 1024 }
  0x49   : > { %1160 = vmatprep.subr.bf16.mxu1 %v2164_v29 }
  0x4a   : > { %s455_s17 = scalar_lea.vmem %s2739_s1, %s1850_s24  ;;  %s1715_s24 = scalar_lea.hbm %s2729_s11, %s1983_s20 }
  0x4b   : > { %1120 = vmatpush1.bf16.msra.mxu0 %v2166_v30 }
  0x4c   : > { %1161 = vmatpush1.bf16.msra.mxu1 %v2167_v31  ;;  %1121 = vmatprep.subr.bf16.mxu0 %v2168_v32 }
  0x4d   : > { %1162 = vmatprep.subr.bf16.mxu1 %v2170_v33 }
  0x4f   : > { %1122 = vmatpush2.bf16.msra.mxu0 %v2172_v34 }
  0x50   : > { %1163 = vmatpush2.bf16.msra.mxu1 %v2173_v35  ;;  %1123 = vmatprep.subr.bf16.mxu0 %v2174_v36  ;;  %v2216_v35 = vld [vmem:[#allocation6 + $0x170] ss:$12 sps:$4 sm:$0xff]  }
  0x51   : > { %1164 = vmatprep.subr.bf16.mxu1 %v2176_v37  ;;  %v2217_v36 = vld [vmem:[#allocation6 + $0x2f0] ss:$12 sps:$4 sm:$0xff]  }
  0x52   : > { %v2218_v37 = vld [vmem:[#allocation6 + $0xb0] ss:$12 sps:$4 sm:$0xff]  }
  0x53   : > { %1124 = vmatpush2.bf16.msra.mxu0 %v2178_v38  ;;  %v2219_v38 = vld [vmem:[#allocation6 + $0x230] ss:$12 sps:$4 sm:$0xff]  }
  0x54   : > { %1165 = vmatpush2.bf16.msra.mxu1 %v2179_v39  ;;  %1125 = vmatprep.subr.bf16.mxu0 %v2180_v40  ;;  %v2220_v39 = vld [vmem:[#allocation6 + $0x158] ss:$12 sps:$4 sm:$0xff]  }
  0x55   : > { %1166 = vmatprep.subr.bf16.mxu1 %v2182_v41  ;;  %v2221_v40 = vld [vmem:[#allocation6 + $0x2d8] ss:$12 sps:$4 sm:$0xff]  }
  0x56   : > { %v2222_v41 = vld [vmem:[#allocation6 + $0x98] ss:$12 sps:$4 sm:$0xff]  }
  0x57   : > { %1126 = vmatpush2.bf16.msra.mxu0 %v2184_v42  ;;  %v2223_v42 = vld [vmem:[#allocation6 + $0x218] ss:$12 sps:$4 sm:$0xff]  }
  0x58   : > { %1167 = vmatpush2.bf16.msra.mxu1 %v2185_v43  ;;  %1127 = vmatprep.subr.bf16.mxu0 %v2186_v44  ;;  %v2224_v43 = vld [vmem:[#allocation6 + $0x140] ss:$12 sps:$4 sm:$0xff]  }
  0x59   : > { %1168 = vmatprep.subr.bf16.mxu1 %v2188_v45  ;;  %v2225_v44 = vld [vmem:[#allocation6 + $0x2c0] ss:$12 sps:$4 sm:$0xff]  }
  0x5a   : > { %v2226_v45 = vld [vmem:[#allocation6 + $0x80] ss:$12 sps:$4 sm:$0xff]  }
  0x5b   : > { %1128 = vmatpush2.bf16.msra.mxu0 %v2190_v47  ;;  %v2227_v47 = vld [vmem:[#allocation6 + $0x200] ss:$12 sps:$4 sm:$0xff]  }
  0x5c   : > { %1169 = vmatpush2.bf16.msra.mxu1 %v2191_v48  ;;  %1129 = vmatprep.subr.bf16.mxu0 %v2192_v51  ;;  %v2228_v48 = vld [vmem:[#allocation6 + $0x128] ss:$12 sps:$4 sm:$0xff]  }
  0x5d   : > { %1170 = vmatprep.subr.bf16.mxu1 %v2194_v52  ;;  %v2230_v51 = vld [vmem:[#allocation6 + $0x68] ss:$12 sps:$4 sm:$0xff]  }
  0x5e   : > { %v2231_v52 = vld [vmem:[#allocation6 + $0x1e8] ss:$12 sps:$4 sm:$0xff]  }
  0x5f   : > { %1130 = vmatpush2.bf16.msra.mxu0 %v2196_v54  ;;  %v2233_v54 = vld [vmem:[#allocation6 + $0x290] ss:$12 sps:$4 sm:$0xff]  }
  0x60   : > { %1171 = vmatpush2.bf16.msra.mxu1 %v2197_v55  ;;  %1131 = vmatprep.subr.bf16.mxu0 %v2198_v56  ;;  %v2234_v55 = vld [vmem:[#allocation6 + $0x50] ss:$12 sps:$4 sm:$0xff]  }
  0x61   : > { %1172 = vmatprep.subr.bf16.mxu1 %v2200_v57  ;;  %v2235_v56 = vld [vmem:[#allocation6 + $0x1d0] ss:$12 sps:$4 sm:$0xff]   ;;  %v2236_v57 = vld [vmem:[#allocation6 + $0xf8] ss:$12 sps:$4 sm:$0xff]  }
  0x63   : > { %1132 = vmatpush2.bf16.msra.mxu0 %v2202_v58  ;;  %v2237_v58 = vld [vmem:[#allocation6 + $0x278] ss:$12 sps:$4 sm:$0xff]  }
  0x64   : > { %1173 = vmatpush2.bf16.msra.mxu1 %v2203_v59  ;;  %1133 = vmatprep.subr.bf16.mxu0 %v2204_v60  ;;  %v2238_v59 = vld [vmem:[#allocation6 + $0x38] ss:$12 sps:$4 sm:$0xff]  }
  0x65   : > { %1174 = vmatprep.subr.bf16.mxu1 %v2206_v61  ;;  %v2239_v60 = vld [vmem:[#allocation6 + $0x1b8] ss:$12 sps:$4 sm:$0xff]   ;;  %v2240_v61 = vld [vmem:[#allocation6 + $0xe0] ss:$12 sps:$4 sm:$0xff]  }
  0x67   : > { %1134 = vmatpush2.bf16.msra.mxu0 %v2208_v62  ;;  %v2241_v62 = vld [vmem:[#allocation6 + $0x260] ss:$12 sps:$4 sm:$0xff]  }
  0x68   : > { %1175 = vmatpush2.bf16.msra.mxu1 %v2209_v63  ;;  %1135 = vmatprep.subr.bf16.mxu0 %v2210_v0  ;;  %v2242_v63 = vld [vmem:[#allocation6 + $0x20] ss:$12 sps:$4 sm:$0xff]  }
  0x69   : > { %1176 = vmatprep.subr.bf16.mxu1 %v2212_v1  ;;  %v2243_v0 = vld [vmem:[#allocation6 + $0x1a0] ss:$12 sps:$4 sm:$0xff]   ;;  %v2244_v1 = vld [vmem:[#allocation6 + $0xc8] ss:$12 sps:$4 sm:$0xff]  }
  0x6b   : > { %1136 = vmatpush2.bf16.msra.mxu0 %v2214_v2  ;;  %v2245_v2 = vld [vmem:[#allocation6 + $0x248] ss:$12 sps:$4 sm:$0xff]  }
  0x6c   : > { %1177 = vmatpush2.bf16.msra.mxu1 %v2215_v3  ;;  %1984 = vmatprep.subr.bf16.mxu0 %v2216_v35  ;;  %v2246_v3 = vld [vmem:[#allocation6 + $0x8] ss:$12 sps:$4 sm:$0xff]  }
  0x6d   : > { %2006 = vmatprep.subr.bf16.mxu1 %v2217_v36 }
  0x6e   : > { %1138 = vmatmul.mubr.bf16.vlgmr.msra.gmra.mxu0 %v2560_v6 }
  0x6f   : > { %1179 = vmatmul.mubr.bf16.vlgmr.msra.gmra.mxu1 %v2564_v7  ;;  %1219 = vmatprep.mubr.bf16.mxu0 %v462_v49  ;;  %v2229_v49 = vld [vmem:[#allocation6 + $0x2a8] ss:$12 sps:$4 sm:$0xff]  }
  0x70   : > { %1259 = vmatprep.mubr.bf16.mxu1 %v464_v53  ;;  %1985 = vmatpush3.bf16.msra.mxu0 %v2218_v37  ;;  %v2232_v53 = vld [vmem:[#allocation6 + $0x110] ss:$12 sps:$4 sm:$0xff]  }
  0x71   : > { %2007 = vmatpush3.bf16.msra.mxu1 %v2219_v38  ;;  %1986 = vmatprep.subr.bf16.mxu0 %v2220_v39 }
  0x72   : > { %2008 = vmatprep.subr.bf16.mxu1 %v2221_v40 }
  0x74   : > { %1987 = vmatpush3.bf16.msra.mxu0 %v2222_v41 }
  0x75   : > { %2009 = vmatpush3.bf16.msra.mxu1 %v2223_v42  ;;  %1988 = vmatprep.subr.bf16.mxu0 %v2224_v43 }
  0x76   : > { %2010 = vmatprep.subr.bf16.mxu1 %v2225_v44 }
  0x78   : > { %1989 = vmatpush3.bf16.msra.mxu0 %v2226_v45 }
  0x79   : > { %2011 = vmatpush3.bf16.msra.mxu1 %v2227_v47  ;;  %1990 = vmatprep.subr.bf16.mxu0 %v2228_v48 }
  0x7a   : > { %2012 = vmatprep.subr.bf16.mxu1 %v2229_v49 }
  0x7c   : > { %1991 = vmatpush3.bf16.msra.mxu0 %v2230_v51 }
  0x7d   : > { %2013 = vmatpush3.bf16.msra.mxu1 %v2231_v52  ;;  %1992 = vmatprep.subr.bf16.mxu0 %v2232_v53 }
  0x7e   : > { %2014 = vmatprep.subr.bf16.mxu1 %v2233_v54 }
  0x80   : > { %1993 = vmatpush3.bf16.msra.mxu0 %v2234_v55 }
  0x81   : > { %2015 = vmatpush3.bf16.msra.mxu1 %v2235_v56  ;;  %1994 = vmatprep.subr.bf16.mxu0 %v2236_v57 }
  0x82   : > { %2016 = vmatprep.subr.bf16.mxu1 %v2237_v58 }
  0x84   : > { %1995 = vmatpush3.bf16.msra.mxu0 %v2238_v59 }
  0x85   : > { %2017 = vmatpush3.bf16.msra.mxu1 %v2239_v60  ;;  %1996 = vmatprep.subr.bf16.mxu0 %v2240_v61 }
  0x86   : > { %2018 = vmatprep.subr.bf16.mxu1 %v2241_v62 }
  0x88   : > { %1997 = vmatpush3.bf16.msra.mxu0 %v2242_v63 }
  0x89   : > { %2019 = vmatpush3.bf16.msra.mxu1 %v2243_v0  ;;  %1998 = vmatprep.subr.bf16.mxu0 %v2244_v1 }
  0x8a   : > { %2020 = vmatprep.subr.bf16.mxu1 %v2245_v2 }
  0x8c   : > { %1999 = vmatpush3.bf16.msra.mxu0 %v2246_v3 }
  0x8d   : > { %2021 = vmatpush3.bf16.msra.mxu1 %v2247_v11  ;;  %2037 = vmatprep.subr.bf16.mxu0 %v2389_v12 }
  0x8f   : > { %1220 = vmatmul.mubr.bf16.vlgmr.msra.gmra.mxu0 %v2560_v6 }
  0x90   : > { %1260 = vmatmul.mubr.bf16.vlgmr.msra.gmra.mxu1 %v2564_v7 }
 0x12e   : > { %v1139_v14 = vpop.f32.mrf.mxu0 }
 0x12f   : > { %v1180_v15 = vpop.f32.mrf.mxu1 }
 0x130   : > { %v1181_v16 = vadd.f32 %v1180_v15, %v1139_v14  ;;  %v1141_v18 = vpop.f32.mrf.mxu0 }
 0x131   : > { %v1182_v19 = vpop.f32.mrf.mxu1 }
 0x132   : > { %v1279_v21 = vadd.f32 %v1272_v13, %v1181_v16  ;;  %v1183_v22 = vadd.f32 %v1182_v19, %v1141_v18  ;;  %v1143_v23 = vpop.f32.mrf.mxu0  ;;  %v1301_v13 = vstv %s1300_s23  ;;  %v2390_v19 = vmov 1966171168   ;;  %s1847_s23 = sshll.u32 %s2648_s22, 5 }
 0x133   : > { %v1184_v24 = vpop.f32.mrf.mxu1  ;;  %v1318_v20 = vunpack.c.l.s4 %v2390_v19  ;;  %s440_s13 = scalar_lea.vmem [#allocation9], %s1847_s23 }
 0x134   : > { %v1281_v25 = vmax.f32 %v1279_v21, 0.0  ;;  %v1280_v26 = vadd.f32 %v1276_v17, %v1183_v22  ;;  %v1144_v29 = vpop.f32.mrf.mxu0  ;;  %v1309_v21 = vld [vmem:[%s455_s17] sm:$0xff]  ;;  %s1717_s30 = sshll.u32 %s440_s13, 4  ;;  %s1699_s17 = scalar_lea.sflag [#allocation8], %s2648_s22  ;;  %s1718_s30 = int_to_ptr.vmem [resolvable:$true] %s1717_s30 }
 0x135   : > { %v1185_v30 = vpop.f32.mrf.mxu1  ;;  %v1319_v6 = vunpack.c.0.s8 %v1318_v20  ;;  %v1310_v22 = vmul.f32 0.05, %v1309_v21  ;;  %s2290_s10 = scalar_lea.vmem %s1718_s30, 512  ;;  %p2297_p11 = scmp.lt.s32.totalorder %s1718_s30, %s2295_s19 }
 0x136   : > { %v1282_v31 = vmax.f32 %v1280_v26, 0.0  ;;  %v1295_v32 = vmul.f32 %v1288_v27, %v1281_v25  ;;  %p2291_p8 = scmp.ne.s32.totalorder %s1718_s30, %s2290_s10  ;;  %p2298_p12 = scmp.lt.s32.totalorder %s2296_s0, %s2290_s10 }
 0x137   : > { %v1322_v7 = vsub.s32 %v1319_v6, %v2569_v9 }
 0x138   : > { %v1296_v33 = vmul.f32 %v1292_v28, %v1282_v31  ;;  %p2292_p9 = pnand %p2291_p8, %p2504_p5  ;;  %p2299_p13 = por %p2298_p12, %p2297_p11 }
 0x13a   : > { %v1297_v34 = vadd.f32 %v1296_v33, %v1295_v32  ;;  %p2293_p10 = pneg %p2292_p9 }
 0x13c   : > { %1298 = vadd.xlane.f32.xlu0 %v1297_v34  ;;  %p2300_p0 = pnand %p2299_p13, %p2293_p10 }
 0x1c5   : > { %v1299_v14 = vpop.xlane.xlu0 %1298 }
 0x1c6   : > { %v1302_v15 = vadd.f32 %v1301_v13, %v1299_v14 }
 0x1c8   : > { %v1947_v16 = vmul.f32 -1.442695, %v1302_v15 }
 0x1ca   : > { %2256 = vpow2.f32 %v1947_v16 }
 0x1d7   : > { %v2257_v17 = vpop.eup %2256 }
 0x1d8   : > { %v1306_v18 = vadd.f32 1.0, %v2257_v17 }
 0x1da   : > { %2258 = vrcp.f32 %v1306_v18 }
 0x1e7   : > { %v2259_v23 = vpop.eup %2258 }
 0x1e8   : > { %v1311_v24 = vadd.f32 %v2259_v23, %v1310_v22 }
 0x1ea   : > { %v1316_v25 = vcombine.high %v1311_v24, %v1311_v24  ;;  %v1323_v26 = vrot.slane %v1311_v24, %v1322_v7 }
 0x1ec   : > { %v1330_v27 = vrot.slane %v1316_v25, %v1322_v7  ;;  %v1331_v28 = vcombine.high %v1323_v26, %v1323_v26  ;;  %v1339_v29 = vrot.slane %v1323_v26, %v1322_v7 }
 0x1ee   : > { %v1332_v30 = vcombine.high %v1330_v27, %v1330_v27  ;;  %v1346_v31 = vrot.slane %v1330_v27, %v1322_v7  ;;  %v1353_v32 = vrot.slane %v1331_v28, %v1322_v7  ;;  %v1361_v33 = vcombine.high %v1339_v29, %v1339_v29 }
 0x1ef   : > { %v1368_v34 = vrot.slane %v1339_v29, %v2572_v10 }
 0x1f0   : > { %v1360_v35 = vrot.slane %v1332_v30, %v1322_v7  ;;  %v1362_v36 = vcombine.high %v1346_v31, %v1346_v31  ;;  %v1363_v37 = vcombine.high %v1353_v32, %v1353_v32  ;;  %v1372_v38 = vrot.slane %v1353_v32, %v2572_v10 }
 0x1f1   : > { %v1376_v39 = vrot.slane %v1361_v33, %v2572_v10  ;;  %v1384_v40 = vrot.slane %v1346_v31, %v2572_v10  ;;  %vm1405_vm0 = vcmp.gt.f32.partialorder %v1311_v24, %v1368_v34 }
 0x1f2   : > { %v1364_v41 = vcombine.high %v1360_v35, %v1360_v35  ;;  %v1380_v42 = vrot.slane %v1363_v37, %v2572_v10  ;;  %v1388_v43 = vrot.slane %v1360_v35, %v2572_v10  ;;  %v1392_v44 = vrot.slane %v1362_v36, %v2572_v10 }
 0x1f3   : > { %vm1406_vm1 = vcmp.gt.f32.partialorder %v1311_v24, %v1372_v38  ;;  %vm1407_vm2 = vcmp.gt.f32.partialorder %v1311_v24, %v1376_v39  ;;  %vm1409_vm3 = vcmp.gt.f32.partialorder %v1311_v24, %v1384_v40  ;;  %v1948_v45 = vsel %vm1405_vm0, 1.0, %v2389_v12 }
 0x1f4   : > { %v1396_v47 = vrot.slane %v1364_v41, %v2572_v10  ;;  %vm1408_vm4 = vcmp.gt.f32.partialorder %v1311_v24, %v1380_v42  ;;  %vm1410_vm5 = vcmp.gt.f32.partialorder %v1311_v24, %v1388_v43  ;;  %vm1411_vm6 = vcmp.gt.f32.partialorder %v1311_v24, %v1392_v44 }
 0x1f5   : > { %v1949_v48 = vsel %vm1406_vm1, 1.0, %v2389_v12  ;;  %v1950_v49 = vsel %vm1407_vm2, 1.0, %v2389_v12  ;;  %v1951_v51 = vsel %vm1408_vm4, 1.0, %v2389_v12  ;;  %v1952_v52 = vsel %vm1409_vm3, 1.0, %v2389_v12 }
 0x1f6   : > { %vm1412_vm7 = vcmp.gt.f32.partialorder %v1311_v24, %v1396_v47  ;;  %v1953_v53 = vsel %vm1410_vm5, 1.0, %v2389_v12  ;;  %v1954_v54 = vsel %vm1411_vm6, 1.0, %v2389_v12  ;;  %v1429_v55 = vrot.slane %v1948_v45, 4 }
 0x1f7   : > { %v1955_v56 = vsel %vm1412_vm7, 1.0, %v2389_v12  ;;  %v1435_v10 = vrot.slane %v1949_v48, 4  ;;  %v1441_v57 = vrot.slane %v1950_v49, 4  ;;  %v1447_v58 = vrot.slane %v1951_v51, 4 }
 0x1f8   : > { %v1430_v59 = vadd.f32 %v1948_v45, %v1429_v55  ;;  %v1453_v60 = vrot.slane %v1952_v52, 4  ;;  %v1459_v61 = vrot.slane %v1953_v53, 4  ;;  %v1465_v62 = vrot.slane %v1954_v54, 4 }
 0x1f9   : > { %v1436_v63 = vadd.f32 %v1949_v48, %v1435_v10  ;;  %v1442_v0 = vadd.f32 %v1950_v49, %v1441_v57  ;;  %v1448_v1 = vadd.f32 %v1951_v51, %v1447_v58  ;;  %v1471_v2 = vrot.slane %v1955_v56, 4 }
 0x1fa   : > { %v1431_v3 = vrot.slane %v1430_v59, 2  ;;  %v1454_v11 = vadd.f32 %v1952_v52, %v1453_v60  ;;  %v1460_v13 = vadd.f32 %v1953_v53, %v1459_v61  ;;  %v1466_v14 = vadd.f32 %v1954_v54, %v1465_v62  ;;  %v2248_v62 = vld [vmem:[%s2725_s7 + $0x38] sm:$0xff]  }
 0x1fb   : > { %v1437_v15 = vrot.slane %v1436_v63, 2  ;;  %v1443_v16 = vrot.slane %v1442_v0, 2  ;;  %v1449_v17 = vrot.slane %v1448_v1, 2  ;;  %v1472_v18 = vadd.f32 %v1955_v56, %v1471_v2  ;;  %2038 = vmatpush3.bf16.msra.mxu0 %v2248_v62  ;;  %v2252_v2 = vld [vmem:[%s2725_s7 + $0x18] sm:$0xff]  }
 0x1fc   : > { %v1432_v19 = vadd.f32 %v1431_v3, %v1430_v59  ;;  %v1455_v20 = vrot.slane %v1454_v11, 2  ;;  %v1461_v21 = vrot.slane %v1460_v13, 2  ;;  %v1467_v6 = vrot.slane %v1466_v14, 2  ;;  %2039 = vmatprep.subr.bf16.mxu0 %v2389_v12  ;;  %v2253_v3 = vld [vmem:[%s2725_s7 + $0x10] sm:$0xff]  }
 0x1fd   : > { %v1438_v22 = vadd.f32 %v1437_v15, %v1436_v63  ;;  %v1444_v7 = vadd.f32 %v1443_v16, %v1442_v0  ;;  %v1450_v23 = vadd.f32 %v1449_v17, %v1448_v1  ;;  %v1473_v24 = vrot.slane %v1472_v18, 2  ;;  %v2249_v63 = vld [vmem:[%s2725_s7 + $0x30] sm:$0xff]   ;;  %v2250_v0 = vld [vmem:[%s2725_s7 + $0x28] sm:$0xff]   ;;  %v2251_v1 = vld [vmem:[%s2725_s7 + $0x20] sm:$0xff]  }
 0x1fe   : > { %v1433_v25 = vrot.slane %v1432_v19, 1  ;;  %v1456_v26 = vadd.f32 %v1455_v20, %v1454_v11  ;;  %v1462_v27 = vadd.f32 %v1461_v21, %v1460_v13  ;;  %v1468_v28 = vadd.f32 %v1467_v6, %v1466_v14  ;;  %v2000_v11 = vpop.f32.mrf.mxu0  ;;  %v2022_v13 = vpop.f32.mrf.mxu1 }
 0x1ff   : > { %v1439_v29 = vrot.slane %v1438_v22, 1  ;;  %v1445_v30 = vrot.slane %v1444_v7, 1  ;;  %v1451_v31 = vrot.slane %v1450_v23, 1  ;;  %v1474_v32 = vadd.f32 %v1473_v24, %v1472_v18  ;;  %2040 = vmatpush3.bf16.msra.mxu0 %v2249_v63  ;;  %v2255_v24 = vld [vmem:[%s2725_s7] sm:$0xff]  }
 0x200   : > { %v1434_v33 = vadd.f32 %v1433_v25, %v1432_v19  ;;  %v1457_v34 = vrot.slane %v1456_v26, 1  ;;  %v1463_v35 = vrot.slane %v1462_v27, 1  ;;  %v1469_v36 = vrot.slane %v1468_v28, 1  ;;  %2041 = vmatprep.subr.bf16.mxu0 %v2389_v12  ;;  %v2001_v14 = vpop.f32.mrf.mxu0  ;;  %v2023_v15 = vpop.f32.mrf.mxu1 }
 0x201   : > { %v1440_v37 = vadd.f32 %v1439_v29, %v1438_v22  ;;  %v1446_v38 = vadd.f32 %v1445_v30, %v1444_v7  ;;  %v1452_v39 = vadd.f32 %v1451_v31, %v1450_v23  ;;  %v1475_v40 = vrot.slane %v1474_v32, 1  ;;  %v2254_v23 = vld [vmem:[%s2725_s7 + $0x8] sm:$0xff]   ;;  %v1964_v31 = vld [vmem:[%s2724_s6] ss:$0 sm:$0xff] }
 0x202   : > { %v1458_v41 = vadd.f32 %v1457_v34, %v1456_v26  ;;  %v1464_v42 = vadd.f32 %v1463_v35, %v1462_v27  ;;  %vm1477_vm8 = vcmp.lt.f32.partialorder %v1434_v33, 5.0  ;;  %v1470_v43 = vadd.f32 %v1469_v36, %v1468_v28  ;;  %v2003_v18 = vpop.f32.mrf.mxu0  ;;  %v2025_v19 = vpop.f32.mrf.mxu1  ;;  %v1974_v35 = vld [vmem:[%s2727_s9] ss:$0 sm:$0xff] }
 0x203   : > { %vm1478_vm9 = vcmp.lt.f32.partialorder %v1440_v37, 5.0  ;;  %vm1479_vm10 = vcmp.lt.f32.partialorder %v1446_v38, 5.0  ;;  %vm1480_vm11 = vcmp.lt.f32.partialorder %v1452_v39, 5.0  ;;  %v1476_v44 = vadd.f32 %v1475_v40, %v1474_v32  ;;  %2042 = vmatpush3.bf16.msra.mxu0 %v2250_v0 }
 0x204   : > { %v1957_v45 = vsel %vm1478_vm9, 1.0, %v2389_v12  ;;  %v1958_v47 = vsel %vm1479_vm10, 1.0, %v2389_v12  ;;  %vm1481_vm14 = vcmp.lt.f32.partialorder %v1458_v41, 5.0  ;;  %v1956_v48 = vsel %vm1477_vm8, 1.0, %v2389_v12  ;;  %2043 = vmatprep.subr.bf16.mxu0 %v2389_v12  ;;  %v2004_v21 = vpop.f32.mrf.mxu0  ;;  %v2026_v6 = vpop.f32.mrf.mxu1 }
 0x205   : > { %v1959_v49 = vsel %vm1480_vm11, 1.0, %v2389_v12  ;;  %vm1482_vm0 = vcmp.lt.f32.partialorder %v1464_v42, 5.0  ;;  %v1510_v51 = vsel %vm1509_vm12, %v1957_v45, %v1956_v48  ;;  %vm1515_vm1 = vcmask 1044484  }
 0x206   : > { %vm1483_vm2 = vcmp.lt.f32.partialorder %v1470_v43, 5.0  ;;  %v1512_v52 = vsel %vm1511_vm13, %v1958_v47, %v1510_v51  ;;  %vm1517_vm3 = vcmask 1045509   ;;  %vm1484_vm4 = vcmp.lt.f32.partialorder %v1476_v44, 5.0 }
 0x207   : > { %v1960_v53 = vsel %vm1481_vm14, 1.0, %v2389_v12  ;;  %v1514_v54 = vsel %vm1513_vm15, %v1959_v49, %v1512_v52  ;;  %vm1519_vm5 = vcmask 1046534   ;;  %v1961_v55 = vsel %vm1482_vm0, 1.0, %v2389_v12  ;;  %2044 = vmatpush3.bf16.msra.mxu0 %v2251_v1 }
 0x208   : > { %v1516_v56 = vsel %vm1515_vm1, %v1960_v53, %v1514_v54  ;;  %vm1521_vm6 = vcmask 1047559   ;;  %v1962_v10 = vsel %vm1483_vm2, 1.0, %v2389_v12  ;;  %v1963_v58 = vsel %vm1484_vm4, 1.0, %v2389_v12  ;;  %2045 = vmatprep.subr.bf16.mxu0 %v2389_v12 }
 0x209   : > { %v1518_v57 = vsel %vm1517_vm3, %v1961_v55, %v1516_v56  ;;  %v2391_v61 = vmov 0   ;;  %v2002_v16 = vadd.f32 %v2001_v14, %v2000_v11  ;;  %v2024_v17 = vadd.f32 %v2023_v15, %v2022_v13 }
 0x20a   : > { %v1520_v59 = vsel %vm1519_vm5, %v1962_v10, %v1518_v57  ;;  %2118 = vset.pattern.permute.xlu1 %v2391_v61  ;;  %2119 = vset.pattern.permute.xlu0 %v2391_v61  ;;  %vm1528_vm7 = vcmask 7168   ;;  %vm2392_vm8 = vmmov 0   ;;  %vm1675_vm9 = vcmask 261120  }
 0x20b   : > { %v1522_v60 = vsel %vm1521_vm6, %v1963_v58, %v1520_v59  ;;  %2046 = vmatpush3.bf16.msra.mxu0 %v2252_v2  ;;  %v1262_v20 = vadd.f32 %v2024_v17, %v2002_v16  ;;  %2053 = vmatprep.mubr.msk.bf16.mxu0 %vm2392_vm8, %v2389_v12 }
 0x20c   : > { %1524 = vadd.xlane.f32.xlu0 %v1522_v60  ;;  %2047 = vmatprep.subr.bf16.mxu0 %v2389_v12 }
 0x20f   : > { %2048 = vmatpush3.bf16.msra.mxu0 %v2253_v3 }
 0x210   : > { %2049 = vmatprep.subr.bf16.mxu0 %v2389_v12 }
 0x213   : > { %2050 = vmatpush3.bf16.msra.mxu0 %v2254_v23 }
 0x214   : > { %2051 = vmatprep.subr.bf16.mxu0 %v2389_v12 }
 0x217   : > { %2052 = vmatpush3.bf16.msra.mxu0 %v2255_v24 }
 0x295   : > { %v1525_v22 = vpop.xlane.xlu0 %1524 }
 0x296   : > { %v1527_v7 = vmul.f32 0.0078125, %v1525_v22 }
 0x298   : > { %1529 = vst.msk [vmem:[#allocation3] sm:$0xff] %vm1528_vm7, %v1527_v7 }
 0x29f   : > { %v1530_v25 = vld [vmem:[#allocation3] sm:$0xff] }
 0x2a0   : > { %1533 = vperm.xlu1 %2118, %v1530_v25  }
 0x31b   : > { %v1534_v26 = vpop.permute.xlu1 %1533 }
 0x31c   : > { %v1536_v27 = vmul.f32 %v1534_v26, %v2553_v4  ;;  %v1537_v28 = vmul.f32 %v1534_v26, %v2543_v46  ;;  %v1538_v29 = vmul.f32 %v1534_v26, %v2556_v5  ;;  %v1539_v30 = vmul.f32 %v1534_v26, %v2548_v50  ;;  %v1965_v46 = vld [vmem:[%s2726_s8] ss:$0 sm:$0xff] }
 0x31d   : > { %v1544_v12 = vmul.f32 %v1534_v26, %v1262_v20 }
 0x31e   : > { %1540 = vst [vmem:[%s440_s13] sm:$0xff] %v1536_v27  ;;  %1541 = vst [vmem:[%s440_s13 + $0x8] sm:$0xff] %v1537_v28 }
 0x31f   : > { %1542 = vst [vmem:[%s440_s13 + $0x10] sm:$0xff] %v1538_v29  ;;  %1543 = vst [vmem:[%s440_s13 + $0x18] sm:$0xff] %v1539_v30  ;;  %v1552_v32 = vadd.f32 %v1964_v31, %v1544_v12 }
 0x321   : > { %v1553_v33 = vmax.f32 %v1552_v32, 0.0 }
 0x323   : > { %v1554_v4 = vpack.c.bf16 %v1553_v33, %v1553_v33 }
 0x325   : > { %2054 = vmatmul.mubr.bf16.vlgmr.msra.gmra.mxu0 %v1554_v4 }
 0x3e5   : > { %v1660_v50 = vpop.f32.mrf.mxu0 }
 0x3e6   : > { %v1661_v5 = vadd.f32 %v1965_v46, %v1660_v50 }
 0x3e7   : > { %v2055_v34 = vpop.f32.mrf.mxu0 }
 0x3e8   : > { %v1666_v36 = vmax.f32 %v1661_v5, 0.0 }
 0x3e9   : > { %v1663_v37 = vpop.f32.mrf.mxu0 }
 0x3ea   : > { %v1674_v38 = vmul.f32 %v1974_v35, %v1666_v36 }
 0x3eb   : > { %v2056_v39 = vpop.f32.mrf.mxu0 }
 0x3ec   : > { %v1676_v40 = vsel %vm1675_vm9, %v1674_v38, 0.0 }
 0x3ed   : > { %1677 = vadd.xlane.f32.xlu1 %v1676_v40 }
 0x3ee   : > { %2303 = shalt.err (!%p2300_p0)
}
 0x3ef   : > { %s2304_s1 = scalar_lea.hbm %s1715_s24, 512  ;;  %s2308_s21 = scalar_lea.hbm %s2729_s11, 1024 }
 0x3f0   : > { %p2305_p1 = scmp.ne.s32.totalorder %s1715_s24, %s2304_s1  ;;  %p2309_p4 = scmp.lt.s32.totalorder %s1715_s24, %s2729_s11 }
 0x3f1   : > { %p2310_p7 = scmp.lt.s32.totalorder %s2308_s21, %s2304_s1 }
 0x3f2   : > { %p2306_p2 = pnand %p2305_p1, %p2504_p5 }
 0x3f3   : > { %p2311_p6 = por %p2310_p7, %p2309_p4 }
 0x3f4   : > { %p2307_p3 = pneg %p2306_p2 }
 0x3f6   : > { %p2312_p8 = pnand %p2311_p6, %p2307_p3 }
 0x3f8   : > { %2315 = shalt.err (!%p2312_p8)
}
 0x3f9   : > { %2061 = dma.vmem_to_hbm [thread:$0]  (%p2504_p5), %s1718_s30, 512, %s1715_s24, %s1699_s17   ;;  %v1690_v48 = vand.u32 127, %v1269_v8  ;;  %vm1696_vm10 = vcmask 57344  }
 0x3fa   : > { %s1679_s0 = sld [smem:[#allocation5]]  ;;  %s1979_s1 = sshll.u32 %s2487_s5, 4 }
 0x3fb   : > { %v1693_v49 = vsub.s32 %v1690_v48, %v2569_v9  ;;  %s446_s2 = scalar_lea.vmem [#allocation10], %s2648_s22  ;;  %s1728_s17 = scalar_lea.hbm %s2730_s12, %s1979_s1 }
 0x3fc   : > { %s1730_s10 = sshll.u32 %s446_s2, 4  ;;  %s1704_s18 = scalar_lea.sflag [#allocation11], %s2648_s22  ;;  %s1731_s10 = int_to_ptr.vmem [resolvable:$true] %s1730_s10 }
 0x3fd   : > { %s2316_s19 = scalar_lea.vmem %s1731_s10, 16  ;;  %s2394_s13 = smov [#allocation10]  }
 0x3fe   : > { %p2317_p9 = scmp.ne.s32.totalorder %s1731_s10, %s2316_s19  ;;  %s2320_s20 = sshll.u32 %s2394_s13, 4  ;;  %s2321_s20 = int_to_ptr.vmem [resolvable:$false] %s2320_s20 }
 0x3ff   : > { %s2322_s5 = scalar_lea.vmem %s2321_s20, 32  ;;  %p2323_p12 = scmp.lt.s32.totalorder %s1731_s10, %s2321_s20 }
 0x400   : > { %v1680_v41 = vstv %s1679_s0  ;;  %p2318_p10 = pnand %p2317_p9, %p2504_p5  ;;  %p2324_p13 = scmp.lt.s32.totalorder %s2322_s5, %s2316_s19 }
 0x402   : > { %p2319_p11 = pneg %p2318_p10  ;;  %p2325_p0 = por %p2324_p13, %p2323_p12 }
 0x404   : > { %p2326_p1 = pnand %p2325_p0, %p2319_p11 }
 0x476   : > { %v1678_v42 = vpop.xlane.xlu1 %1677 }
 0x477   : > { %v1681_v43 = vadd.f32 %v1680_v41, %v1678_v42 }
 0x479   : > { %v1975_v44 = vmul.f32 -1.442695, %v1681_v43 }
 0x47b   : > { %2260 = vpow2.f32 %v1975_v44 }
 0x488   : > { %v2261_v45 = vpop.eup %2260 }
 0x489   : > { %v1685_v47 = vadd.f32 1.0, %v2261_v45 }
 0x48b   : > { %2262 = vrcp.f32 %v1685_v47 }
 0x498   : > { %v2263_v51 = vpop.eup %2262 }
 0x499   : > { %v1694_v52 = vrot.slane %v2263_v51, %v1693_v49 }
 0x49b   : > { %1697 = vst.msk [vmem:[%s446_s2] sm:$0x1] %vm1696_vm10, %v1694_v52 }
 0x49c   : > { %2329 = shalt.err (!%p2326_p1)
}
 0x49d   : > { %s2330_s21 = scalar_lea.hbm %s1728_s17, 16  ;;  %s2334_s0 = scalar_lea.hbm %s2730_s12, 32 }
 0x49e   : > { %p2331_p2 = scmp.ne.s32.totalorder %s1728_s17, %s2330_s21  ;;  %p2335_p7 = scmp.lt.s32.totalorder %s1728_s17, %s2730_s12 }
 0x49f   : > { %p2336_p6 = scmp.lt.s32.totalorder %s2334_s0, %s2330_s21 }
 0x4a0   : > { %p2332_p3 = pnand %p2331_p2, %p2504_p5 }
 0x4a1   : > { %p2337_p8 = por %p2336_p6, %p2335_p7 }
 0x4a2   : > { %p2333_p4 = pneg %p2332_p3 }
 0x4a4   : > { %p2338_p9 = pnand %p2337_p8, %p2333_p4 }
 0x4a6   : > { %2341 = shalt.err (!%p2338_p9)
}
 0x4a7   : > { %2062 = dma.vmem_to_hbm [thread:$0]  (%p2504_p5), %s1731_s10, 16, %s1728_s17, %s1704_s18  }
 0x4a8 PF: > { %p2078_p10 = scmp.ge.s32.totalorder %s2384_s28, 2  ;;  %s1742_s24 = sand.u32 1, %s2372_s25  }
 0x4a9   : > { %p2740_p11 = scmp.ne.s32.totalorder %s2735_s16, 0  ;;  %s1743_s30 = scalar_lea.sflag [#allocation8], %s1742_s24 }
 0x4ab   : > { %p2070_p12 = pnand %p2078_p10, %p2740_p11 }
 0x4ad   : > { %p2071_p13 = pneg %p2070_p12 }
 0x4af   : > { %2363 = dma.done.wait (%p2071_p13), %s1743_s30, 512  }
 0x4b0   : > { %2365 = vsyncadd (%p2071_p13), %s1743_s30, 4294966784  ;;  %s1752_s19 = scalar_lea.sflag [#allocation11], %s1742_s24 }
 0x4b1   : > { %2367 = dma.done.wait (%p2071_p13), %s1752_s19, 16  }
 0x4b2   : > { %2369 = vsyncadd (%p2071_p13), %s1752_s19, 4294967280  ;;  %p29_p5 = scmp.ge.s32.totalorder %s2491_s29, 4   ;;  %s2741_s25 = smov %s2376_s26 }
 0x4b3   : > { %s2742_s26 = smov %s2380_s27  ;;  %s2743_s27 = smov %s2502_s14 }
 0x4b4   : > { %s2744_s28 = smov %s2491_s29  ;;  %31 = sbr.rel (!%p29_p5) target bundleno = 12 (0xc), region = 124 }
 0x4b9   :  { %1756 = vsyncpa [#allocation7], 1 }
 0x4ba   :  { %1758 = vsyncpa [#allocation7 + $0x1], 1 }
 0x4bb   :  { %1759 = vsyncpa [#allocation8], 1 }
 0x4bc   :  { %1761 = vsyncpa [#allocation8 + $0x1], 1 }
 0x4bd   :  { %1762 = vsyncpa [#allocation11], 1 }
 0x4be   :  { %1764 = vsyncpa [#allocation11 + $0x1], 1 }

</bundles_post_ra>
